<compile_context>
chip_gen: v6e
topology: v6e:2x2x1
jax: 0.10.0
libtpu: 0.0.40
codegen_flags: <defaults>
</compile_context>

<pallas_src>
from functools import partial

import jax
import jax.numpy as jnp
from jax.experimental import pallas as pl
from jax.experimental.pallas import tpu as pltpu


def _round_up(x, m):
    return ((x + m - 1) // m) * m


def _pick_tile(n_pad, target):
    """Largest multiple of 128 that is <= target and divides n_pad."""
    t = min(_round_up(target, 128), n_pad)
    while n_pad % t:
        t -= 128
    return t


def _knn_kernel(q_ref, c_ref, out_ref, *, num_neighbors, n_points):
    """One (query-tile i, candidate-tile j) grid step.

    q_ref:   (2, TQ)  lane-dense x/y rows for the query tile.
    c_ref:   (TC, 2)  candidate tile, x/y as columns.
    out_ref: (k, TQ)  resident accumulator across j; holds squared distances
             until the last candidate tile, then the sqrt'd result.
    """
    k = num_neighbors
    tq = q_ref.shape[1]
    tc = c_ref.shape[0]
    i = pl.program_id(0)          # query-tile index   (parallel)
    j = pl.program_id(1)          # candidate-tile idx (reduction, last)

    # Init the running top-k (squared) distances at the first candidate tile.
    @pl.when(j == 0)
    def _():
        out_ref[...] = jnp.full(out_ref.shape, jnp.inf, dtype=out_ref.dtype)

    xq = q_ref[0:1, :]            # (1, TQ) lane-dense
    yq = q_ref[1:2, :]
    c = c_ref[...]
    xc = c[:, 0:1]                # (TC, 1)
    yc = c[:, 1:2]

    dx = xc - xq                  # (TC, TQ): sublane-bcast row vs lane-bcast col
    dy = yc - yq
    d2 = dx * dx + dy * dy        # pure VPU; no MXU reformulation (precision)

    acc = out_ref[...]            # (k, TQ) running squared distances
    comb = jnp.concatenate([d2, acc], axis=0)          # (TC + k, TQ)

    rows = jax.lax.broadcasted_iota(jnp.int32, (tc + k, tq), 0)
    qgid = jax.lax.broadcasted_iota(jnp.int32, (tc + k, tq), 1) + i * tq
    cgid = rows + j * tc
    inf = jnp.float32(jnp.inf)
    # Mask only the candidate part of `comb`: self-distance + padding columns.
    invalid = (rows < tc) & ((cgid == qgid) | (cgid >= n_points))
    comb = jnp.where(invalid, inf, comb)

    # k iterative min-extractions over the sublane axis -> lane-dense (1, TQ)
    # rows.  Ties are knocked out one occurrence at a time (first row index),
    # so duplicate distances are preserved like a full sort would.
    mins = []
    for it in range(k):
        m = jnp.min(comb, axis=0, keepdims=True)        # (1, TQ)
        mins.append(m)
        if it + 1 < k:
            eq = comb == m
            first = jnp.min(jnp.where(eq, rows, jnp.int32(tc + k)),
                            axis=0, keepdims=True)
            comb = jnp.where(rows == first, inf, comb)

    new_acc = jnp.concatenate(mins, axis=0)             # (k, TQ), squared

    is_last = j == pl.num_programs(1) - 1

    @pl.when(jnp.logical_not(is_last))
    def _():
        out_ref[...] = new_acc

    @pl.when(is_last)
    def _():
        out_ref[...] = jnp.sqrt(new_acc)


def get_knearest_neighbors(p, num_neighbors, *, tq=512, tc=1024):
    """JAX wrapper. p: [N, D] with D >= 2. Returns [N, num_neighbors] float32."""
    p = jnp.asarray(p)
    N, D = p.shape
    if D < 2:
        raise ValueError("p must have at least 2 feature columns (x, y)")
    k = int(num_neighbors)
    if not (1 <= k < N):
        # sklearn's kneighbors(n_neighbors=k+1) would raise in this case too.
        raise ValueError(f"num_neighbors must be in [1, N-1]; got {k} with N={N}")

    xy = p[:, :2].astype(jnp.float32)
    n_pad = _round_up(N, 128)
    tq = _pick_tile(n_pad, tq)
    tc = _pick_tile(n_pad, tc)

    xy_pad = jnp.pad(xy, ((0, n_pad - N), (0, 0)))      # (n_pad, 2)
    q_lane = xy_pad.T                                   # (2, n_pad) lane-dense
    c_sub = xy_pad                                      # (n_pad, 2)

    grid = (n_pad // tq, n_pad // tc)
    kernel = partial(_knn_kernel, num_neighbors=k, n_points=N)

    out = pl.pallas_call(
        kernel,
        out_shape=jax.ShapeDtypeStruct((k, n_pad), jnp.float32),
        grid_spec=pltpu.PrefetchScalarGridSpec(
            num_scalar_prefetch=0,
            grid=grid,
            in_specs=[
                pl.BlockSpec((2, tq), lambda i, j: (0, i)),   # query tile
                pl.BlockSpec((tc, 2), lambda i, j: (j, 0)),   # candidate tile
            ],
            out_specs=pl.BlockSpec((k, tq), lambda i, j: (0, i)),
        ),
        compiler_params=pltpu.CompilerParams(
            dimension_semantics=("parallel", "arbitrary"),
            vmem_limit_bytes=48 * 1024 * 1024,  # <= v7x physical 64 MiB
        ),
    )(q_lane, c_sub)

    # Lane-dense [k, n_pad] -> [N, k] (wrapper-side plumbing).
    return out[:, :N].T


def _reference(p, num_neighbors):
    """Pure-JAX reference mirroring the PyTorch/sklearn semantics."""
    xy = p[:, :2].astype(jnp.float32)
    d2 = jnp.sum((xy[:, None, :] - xy[None, :, :]) ** 2, axis=-1)
    N = xy.shape[0]
    d2 = jnp.where(jnp.eye(N, dtype=bool), jnp.inf, d2)
    d2_sorted = jnp.sort(d2, axis=1)[:, :num_neighbors]
    return jnp.sqrt(d2_sorted)


if __name__ == "__main__":
    key = jax.random.PRNGKey(0)
    k1, k2 = jax.random.split(key)

    # Toy case matching the module's usage: 64 points with (x, y, z) features.
    N1, D1, K1 = 64, 3, 4
    p1 = jax.random.normal(k1, (N1, D1), dtype=jnp.float32)
    out1 = jax.block_until_ready(get_knearest_neighbors(p1, K1))
    ref1 = _reference(p1, K1)
    assert out1.shape == (N1, K1)
    assert jnp.allclose(out1, ref1, atol=1e-5, rtol=1e-5), "mismatch (small case)"

    # Multi-tile case exercising the (query-tile x candidate-tile) grid,
    # padding masks, and cross-tile accumulation.
    N2, D2, K2 = 300, 4, 5
    p2 = 3.0 * jax.random.normal(k2, (N2, D2), dtype=jnp.float32)
    out2 = jax.block_until_ready(get_knearest_neighbors(p2, K2, tq=128, tc=128))
    ref2 = _reference(p2, K2)
    assert out2.shape == (N2, K2)
    assert jnp.allclose(out2, ref2, atol=1e-5, rtol=1e-5), "mismatch (tiled case)"

    print("KERNEL_OK")
</pallas_src>

<mosaic_0001>
module attributes {stable_mosaic.version = 11 : i64} {
  func.func @_knn_kernel(%arg0: i32, %arg1: i32, %arg2: memref<2x128xf32, #tpu.memory_space<vmem>>, %arg3: memref<128x2xf32, #tpu.memory_space<vmem>>, %arg4: memref<4x128xf32, #tpu.memory_space<vmem>>) attributes {dimension_semantics = [#tpu.dimension_semantics<parallel>, #tpu.dimension_semantics<arbitrary>], iteration_bounds = array<i64: 1, 1>, scalar_prefetch = 0 : i64, scratch_operands = 0 : i64, tpu.core_type = #tpu.core_type<tc>, window_params = [{transform_indices = @transform_0, window_bounds = array<i64: 2, 128>}, {transform_indices = @transform_1, window_bounds = array<i64: 128, 2>}, {transform_indices = @transform_2, window_bounds = array<i64: 4, 128>}]} {
    %c0_i32 = arith.constant 0 : i32
    %0 = arith.cmpi eq, %arg1, %c0_i32 : i32
    %1 = arith.extui %0 : i1 to i32
    %c0_i32_0 = arith.constant 0 : i32
    %2 = arith.cmpi ne, %1, %c0_i32_0 : i32
    scf.if %2 {
      %cst_24 = arith.constant 0x7F800000 : f32
      %81 = vector.broadcast %cst_24 : f32 to vector<4x128xf32>
      %c0_25 = arith.constant 0 : index
      %c0_26 = arith.constant 0 : index
      %82 = vector.load %arg4[%c0_25, %c0_26] : memref<4x128xf32, #tpu.memory_space<vmem>>, vector<4x128xf32>
      tpu.vector_store %arg4[%c0_25, %c0_26], %81 {strides = array<i32>} : memref<4x128xf32, #tpu.memory_space<vmem>>, vector<4x128xf32>,
    } else {
    }
    %c0 = arith.constant 0 : index
    %c0_1 = arith.constant 0 : index
    %3 = vector.load %arg2[%c0, %c0_1] : memref<2x128xf32, #tpu.memory_space<vmem>>, vector<1x128xf32>
    %c1 = arith.constant 1 : index
    %c0_2 = arith.constant 0 : index
    %4 = vector.load %arg2[%c1, %c0_2] : memref<2x128xf32, #tpu.memory_space<vmem>>, vector<1x128xf32>
    %c0_3 = arith.constant 0 : index
    %c0_4 = arith.constant 0 : index
    %5 = vector.load %arg3[%c0_3, %c0_4] : memref<128x2xf32, #tpu.memory_space<vmem>>, vector<128x2xf32>
    %6 = vector.extract_strided_slice %5 {offsets = [0, 0], sizes = [128, 1], strides = [1, 1]} : vector<128x2xf32> to vector<128x1xf32>
    %7 = vector.extract_strided_slice %5 {offsets = [0, 1], sizes = [128, 1], strides = [1, 1]} : vector<128x2xf32> to vector<128x1xf32>
    %8 = vector.broadcast %6 : vector<128x1xf32> to vector<128x128xf32>
    %9 = vector.broadcast %3 : vector<1x128xf32> to vector<128x128xf32>
    %10 = arith.subf %8, %9 : vector<128x128xf32>
    %11 = vector.broadcast %7 : vector<128x1xf32> to vector<128x128xf32>
    %12 = vector.broadcast %4 : vector<1x128xf32> to vector<128x128xf32>
    %13 = arith.subf %11, %12 : vector<128x128xf32>
    %14 = arith.mulf %10, %10 : vector<128x128xf32>
    %15 = arith.mulf %13, %13 : vector<128x128xf32>
    %16 = arith.addf %14, %15 : vector<128x128xf32>
    %c0_5 = arith.constant 0 : index
    %c0_6 = arith.constant 0 : index
    %17 = vector.load %arg4[%c0_5, %c0_6] : memref<4x128xf32, #tpu.memory_space<vmem>>, vector<4x128xf32>
    %18 = tpu.concatenate %16, %17 in 0 : vector<128x128xf32>, vector<4x128xf32> -> vector<132x128xf32>
    %19 = tpu.iota {dimensions = array<i32: 0>} : vector<132x128xi32>
    %20 = tpu.iota {dimensions = array<i32: 1>} : vector<132x128xi32>
    %c128_i32 = arith.constant 128 : i32
    %21 = arith.muli %arg0, %c128_i32 : i32
    %22 = vector.broadcast %21 : i32 to vector<132x128xi32>
    %23 = arith.addi %20, %22 : vector<132x128xi32>
    %c128_i32_7 = arith.constant 128 : i32
    %24 = arith.muli %arg1, %c128_i32_7 : i32
    %25 = vector.broadcast %24 : i32 to vector<132x128xi32>
    %26 = arith.addi %19, %25 : vector<132x128xi32>
    %c128_i32_8 = arith.constant 128 : i32
    %27 = vector.broadcast %c128_i32_8 : i32 to vector<132x128xi32>
    %28 = arith.cmpi slt, %19, %27 : vector<132x128xi32>
    %29 = arith.cmpi eq, %26, %23 : vector<132x128xi32>
    %c64_i32 = arith.constant 64 : i32
    %30 = vector.broadcast %c64_i32 : i32 to vector<132x128xi32>
    %31 = arith.cmpi sge, %26, %30 : vector<132x128xi32>
    %32 = arith.ori %29, %31 : vector<132x128xi1>
    %33 = arith.andi %28, %32 : vector<132x128xi1>
    %cst = arith.constant 0x7F800000 : f32
    %34 = vector.broadcast %cst : f32 to vector<132x128xf32>
    %35 = arith.select %33, %34, %18 : vector<132x128xi1>, vector<132x128xf32>
    %cst_9 = arith.constant dense<0x7F800000> : vector<128xf32>
    %36 = vector.multi_reduction <minimumf>, %35, %cst_9 [0] : vector<132x128xf32> to vector<128xf32>
    %37 = vector.shape_cast %36 : vector<128xf32> to vector<1x128xf32>
    %38 = vector.broadcast %37 : vector<1x128xf32> to vector<132x128xf32>
    %39 = arith.cmpf oeq, %35, %38 : vector<132x128xf32>
    %c132_i32 = arith.constant 132 : i32
    %40 = vector.broadcast %c132_i32 : i32 to vector<132x128xi32>
    %41 = arith.select %39, %19, %40 : vector<132x128xi1>, vector<132x128xi32>
    %cst_10 = arith.constant dense<2147483647> : vector<128xi32>
    %42 = vector.multi_reduction <minsi>, %41, %cst_10 [0] : vector<132x128xi32> to vector<128xi32>
    %43 = vector.shape_cast %42 : vector<128xi32> to vector<1x128xi32>
    %44 = vector.broadcast %43 : vector<1x128xi32> to vector<132x128xi32>
    %45 = arith.cmpi eq, %19, %44 : vector<132x128xi32>
    %cst_11 = arith.constant 0x7F800000 : f32
    %46 = vector.broadcast %cst_11 : f32 to vector<132x128xf32>
    %47 = arith.select %45, %46, %35 : vector<132x128xi1>, vector<132x128xf32>
    %cst_12 = arith.constant dense<0x7F800000> : vector<128xf32>
    %48 = vector.multi_reduction <minimumf>, %47, %cst_12 [0] : vector<132x128xf32> to vector<128xf32>
    %49 = vector.shape_cast %48 : vector<128xf32> to vector<1x128xf32>
    %50 = vector.broadcast %49 : vector<1x128xf32> to vector<132x128xf32>
    %51 = arith.cmpf oeq, %47, %50 : vector<132x128xf32>
    %c132_i32_13 = arith.constant 132 : i32
    %52 = vector.broadcast %c132_i32_13 : i32 to vector<132x128xi32>
    %53 = arith.select %51, %19, %52 : vector<132x128xi1>, vector<132x128xi32>
    %cst_14 = arith.constant dense<2147483647> : vector<128xi32>
    %54 = vector.multi_reduction <minsi>, %53, %cst_14 [0] : vector<132x128xi32> to vector<128xi32>
    %55 = vector.shape_cast %54 : vector<128xi32> to vector<1x128xi32>
    %56 = vector.broadcast %55 : vector<1x128xi32> to vector<132x128xi32>
    %57 = arith.cmpi eq, %19, %56 : vector<132x128xi32>
    %cst_15 = arith.constant 0x7F800000 : f32
    %58 = vector.broadcast %cst_15 : f32 to vector<132x128xf32>
    %59 = arith.select %57, %58, %47 : vector<132x128xi1>, vector<132x128xf32>
    %cst_16 = arith.constant dense<0x7F800000> : vector<128xf32>
    %60 = vector.multi_reduction <minimumf>, %59, %cst_16 [0] : vector<132x128xf32> to vector<128xf32>
    %61 = vector.shape_cast %60 : vector<128xf32> to vector<1x128xf32>
    %62 = vector.broadcast %61 : vector<1x128xf32> to vector<132x128xf32>
    %63 = arith.cmpf oeq, %59, %62 : vector<132x128xf32>
    %c132_i32_17 = arith.constant 132 : i32
    %64 = vector.broadcast %c132_i32_17 : i32 to vector<132x128xi32>
    %65 = arith.select %63, %19, %64 : vector<132x128xi1>, vector<132x128xi32>
    %cst_18 = arith.constant dense<2147483647> : vector<128xi32>
    %66 = vector.multi_reduction <minsi>, %65, %cst_18 [0] : vector<132x128xi32> to vector<128xi32>
    %67 = vector.shape_cast %66 : vector<128xi32> to vector<1x128xi32>
    %68 = vector.broadcast %67 : vector<1x128xi32> to vector<132x128xi32>
    %69 = arith.cmpi eq, %19, %68 : vector<132x128xi32>
    %cst_19 = arith.constant 0x7F800000 : f32
    %70 = vector.broadcast %cst_19 : f32 to vector<132x128xf32>
    %71 = arith.select %69, %70, %59 : vector<132x128xi1>, vector<132x128xf32>
    %cst_20 = arith.constant dense<0x7F800000> : vector<128xf32>
    %72 = vector.multi_reduction <minimumf>, %71, %cst_20 [0] : vector<132x128xf32> to vector<128xf32>
    %73 = vector.shape_cast %72 : vector<128xf32> to vector<1x128xf32>
    %74 = tpu.concatenate %37, %49, %61, %73 in 0 : vector<1x128xf32>, vector<1x128xf32>, vector<1x128xf32>, vector<1x128xf32> -> vector<4x128xf32>
    %c0_i32_21 = arith.constant 0 : i32
    %75 = arith.cmpi eq, %arg1, %c0_i32_21 : i32
    %true = arith.constant true
    %76 = arith.xori %75, %true : i1
    %77 = arith.extui %76 : i1 to i32
    %c0_i32_22 = arith.constant 0 : i32
    %78 = arith.cmpi ne, %77, %c0_i32_22 : i32
    scf.if %78 {
      %c0_24 = arith.constant 0 : index
      %c0_25 = arith.constant 0 : index
      %81 = vector.load %arg4[%c0_24, %c0_25] : memref<4x128xf32, #tpu.memory_space<vmem>>, vector<4x128xf32>
      tpu.vector_store %arg4[%c0_24, %c0_25], %74 {strides = array<i32>} : memref<4x128xf32, #tpu.memory_space<vmem>>, vector<4x128xf32>,
    } else {
    }
    %79 = arith.extui %75 : i1 to i32
    %c0_i32_23 = arith.constant 0 : i32
    %80 = arith.cmpi ne, %79, %c0_i32_23 : i32
    scf.if %80 {
      %81 = math.sqrt %74 : vector<4x128xf32>
      %c0_24 = arith.constant 0 : index
      %c0_25 = arith.constant 0 : index
      %82 = vector.load %arg4[%c0_24, %c0_25] : memref<4x128xf32, #tpu.memory_space<vmem>>, vector<4x128xf32>
      tpu.vector_store %arg4[%c0_24, %c0_25], %81 {strides = array<i32>} : memref<4x128xf32, #tpu.memory_space<vmem>>, vector<4x128xf32>,
    } else {
    }
    return
  }
  func.func @transform_0(%arg0: i32, %arg1: i32) -> (i32, i32) {
    %c0_i32 = arith.constant 0 : i32
    %c0_i32_0 = arith.constant 0 : i32
    return %c0_i32, %arg0 : i32, i32
  }
  func.func @transform_1(%arg0: i32, %arg1: i32) -> (i32, i32) {
    %c0_i32 = arith.constant 0 : i32
    %c0_i32_0 = arith.constant 0 : i32
    return %arg1, %c0_i32 : i32, i32
  }
  func.func @transform_2(%arg0: i32, %arg1: i32) -> (i32, i32) {
    %c0_i32 = arith.constant 0 : i32
    %c0_i32_0 = arith.constant 0 : i32
    return %c0_i32, %arg0 : i32, i32
  }
}

</mosaic_0001>

<bundles_post_ra>
// kernel: tpu_custom_call.1
= control target key start
LH: loop header
LB: loop body
LE: loop exit
PB: predicated region body
PF: predicated region fallthrough
CT: control target
= control target key end

     0   :  { %v930_v1 = vmov 1   ;;  %v931_v2 = vmov 0   ;;  %v932_v3 = vmov inf   ;;  %s1384_s0 = inlined_call_operand.vmem [shape: f32[2,128], index: 0, kind: input, shape index: {}]   ;;  %s1385_s1 = inlined_call_operand.vmem [shape: f32[128,2], index: 1, kind: input, shape index: {}]   ;;  %s1386_s2 = inlined_call_operand.hbm [shape: f32[4,128], index: 2, kind: output, shape index: {}]  }
   0x1   :  { %v19_v0 = vld [vmem:[%s1385_s1] sm:$0xff]  ;;  %902 = vset.pattern.permute.xlu1 %v930_v1  ;;  %901 = vset.pattern.permute.xlu0 %v931_v2  ;;  %16 = vst [vmem:[#allocation2] sm:$0xf] %v932_v3 }
   0x2   :  { %136 = vperm.xlu1 %902, %v19_v0   ;;  %37 = vperm.xlu0 %901, %v19_v0   ;;  %v23_v4 = vld [vmem:[%s1385_s1 + $0x20] sm:$0xff] }
   0x3   :  { %7 = vsyncpa [#allocation3], 0  ;;  %v20_v5 = vld [vmem:[%s1385_s1 + $0x8] sm:$0xff]  ;;  %v21_v6 = vld [vmem:[%s1385_s1 + $0x10] sm:$0xff]  ;;  %v268_v18 = vlaneseq  ;;  %vm424_vm3 = vcmask 1043456  }
   0x4   :  { %v22_v7 = vld [vmem:[%s1385_s1 + $0x18] sm:$0xff]  ;;  %v24_v8 = vld [vmem:[%s1385_s1 + $0x28] sm:$0xff]  ;;  %v25_v9 = vld [vmem:[%s1385_s1 + $0x30] sm:$0xff] }
   0x5   :  { %v26_v10 = vld [vmem:[%s1385_s1 + $0x38] sm:$0xff]  ;;  %v872_v21 = vld [vmem:[%s1384_s0 + $0x1] ss:$0 sm:$0xff]  ;;  %v976_v22 = vshrl.u32 %v268_v18, 7  ;;  %v871_v23 = vld [vmem:[%s1384_s0] ss:$0 sm:$0xff] }
   0x6   :  { %152 = vperm.xlu1 %902, %v23_v4   ;;  %57 = vperm.xlu0 %901, %v23_v4   ;;  %v981_v25 = vand.u32 127, %v268_v18  ;;  %s933_s0 = smov [#allocation2]  }
   0x7   :  { %v984_v27 = vadd.s32 32, %v976_v22  ;;  %v987_v31 = vadd.s32 8, %v976_v22  ;;  %v990_v33 = vadd.s32 40, %v976_v22  ;;  %v993_v34 = vadd.s32 24, %v976_v22  ;;  %s863_s28 = sshll.u32 %s933_s0, 4  ;;  %s864_s28 = int_to_ptr.vmem [resolvable:$true] %s863_s28 }
   0x8   :  { %vm327_vm0 = vcmp.eq.s32.totalorder %v976_v22, %v981_v25  ;;  %v1002_v42 = vadd.s32 16, %v976_v22  ;;  %v1009_v49 = vadd.s32 56, %v976_v22  ;;  %v1012_v50 = vadd.s32 48, %v976_v22  ;;  %s908_s29 = scalar_lea.vmem %s864_s28, 64  ;;  %p913_p1 = scmp.lt.s32.totalorder %s864_s28, %s864_s28 }
   0x9   :  { %vm331_vm1 = vcmp.eq.s32.totalorder %v984_v27, %v981_v25  ;;  %vm328_vm2 = vcmp.eq.s32.totalorder %v987_v31, %v981_v25  ;;  %vm332_vm4 = vcmp.eq.s32.totalorder %v990_v33, %v981_v25  ;;  %vm330_vm5 = vcmp.eq.s32.totalorder %v993_v34, %v981_v25  ;;  %p909_p0 = scmp.ne.s32.totalorder %s864_s28, %s908_s29  ;;  %p914_p2 = scmp.lt.s32.totalorder %s908_s29, %s908_s29 }
   0xa   :  { %903 = vset.pattern.permute.xlu1 %v931_v2  ;;  %42 = vperm.xlu0 %901, %v20_v5   ;;  %vm334_vm6 = vcmp.eq.s32.totalorder %v1009_v49, %v981_v25  ;;  %vm329_vm7 = vcmp.eq.s32.totalorder %v1002_v42, %v981_v25  ;;  %vm333_vm8 = vcmp.eq.s32.totalorder %v1012_v50, %v981_v25 }
   0xb   :  { %47 = vperm.xlu1 %903, %v21_v6   ;;  %p915_p3 = por %p914_p2, %p913_p1 }
   0xd   :  { %p916_p4 = pnand %p915_p3, %p909_p0 }
   0xe   :  { %52 = vperm.xlu0 %901, %v22_v7  }
   0xf   :  { %62 = vperm.xlu1 %903, %v24_v8  }
  0x12   :  { %67 = vperm.xlu0 %901, %v25_v9  }
  0x13   :  { %72 = vperm.xlu1 %903, %v26_v10  }
  0x16   :  { %904 = vset.pattern.permute.xlu0 %v930_v1 }
  0x17   :  { %905 = vset.pattern.permute.xlu1 %v930_v1  ;;  %140 = vperm.xlu0 %904, %v20_v5  }
  0x18   :  { %144 = vperm.xlu1 %905, %v21_v6  }
  0x1b   :  { %156 = vperm.xlu0 %904, %v24_v8  }
  0x1c   :  { %148 = vperm.xlu1 %905, %v22_v7  }
  0x1f   :  { %164 = vperm.xlu0 %904, %v26_v10  }
  0x20   :  { %160 = vperm.xlu1 %905, %v25_v9  }
  0x7d   :  { %v137_v11 = vpop.permute.xlu1 %136  ;;  %v38_v12 = vpop.permute.xlu0 %37 }
  0x7e   :  { %v203_v29 = vsub.f32 %v137_v11, %v872_v21  ;;  %v119_v30 = vsub.f32 %v38_v12, %v871_v23  ;;  %v1026_v12 = vld [vmem:[#allocation2] sm:$0xf] }
  0x80   :  { %v235_v39 = vmul.f32 %v203_v29, %v203_v29  ;;  %v219_v40 = vmul.f32 %v119_v30, %v119_v30 }
  0x81   :  { %v153_v13 = vpop.permute.xlu1 %152  ;;  %v58_v14 = vpop.permute.xlu0 %57 }
  0x82   :  { %v207_v26 = vsub.f32 %v153_v13, %v872_v21  ;;  %v123_v28 = vsub.f32 %v58_v14, %v871_v23  ;;  %v251_v55 = vadd.f32 %v235_v39, %v219_v40 }
  0x84   :  { %v239_v36 = vmul.f32 %v207_v26, %v207_v26  ;;  %v223_v37 = vmul.f32 %v123_v28, %v123_v28  ;;  %v1024_v8 = vsel %vm327_vm0, inf, %v251_v55  ;;  %v1093_v55 = vadd.s32 128, %v976_v22 }
  0x85   :  { %v43_v15 = vpop.permute.xlu0 %42 }
  0x86   :  { %v48_v16 = vpop.permute.xlu1 %47  ;;  %v120_v43 = vsub.f32 %v43_v15, %v871_v23  ;;  %v255_v51 = vadd.f32 %v239_v36, %v223_v37 }
  0x87   :  { %v121_v52 = vsub.f32 %v48_v16, %v871_v23 }
  0x88   :  { %v220_v59 = vmul.f32 %v120_v43, %v120_v43  ;;  %v1019_v4 = vsel %vm331_vm1, inf, %v255_v51 }
  0x89   :  { %v53_v17 = vpop.permute.xlu0 %52  ;;  %v221_v5 = vmul.f32 %v121_v52, %v121_v52  ;;  %v1084_v52 = vadd.s32 104, %v976_v22 }
  0x8a   :  { %v63_v19 = vpop.permute.xlu1 %62  ;;  %v122_v46 = vsub.f32 %v53_v17, %v871_v23  ;;  %v412_v17 = vmin.f32 %v1024_v8, %v1019_v4 }
  0x8b   :  { %v124_v41 = vsub.f32 %v63_v19, %v871_v23 }
  0x8c   :  { %v222_v0 = vmul.f32 %v122_v46, %v122_v46  ;;  %v1073_v46 = vadd.s32 80, %v976_v22 }
  0x8d   :  { %v68_v20 = vpop.permute.xlu0 %67  ;;  %v224_v56 = vmul.f32 %v124_v41, %v124_v41 }
  0x8e   :  { %v73_v24 = vpop.permute.xlu1 %72  ;;  %v125_v60 = vsub.f32 %v68_v20, %v871_v23 }
  0x8f   :  { %v126_v57 = vsub.f32 %v73_v24, %v871_v23 }
  0x90   :  { %v225_v13 = vmul.f32 %v125_v60, %v125_v60 }
  0x91   :  { %v226_v9 = vmul.f32 %v126_v57, %v126_v57 }
  0x92   :  { %v141_v32 = vpop.permute.xlu0 %140 }
  0x93   :  { %v145_v35 = vpop.permute.xlu1 %144  ;;  %v204_v38 = vsub.f32 %v141_v32, %v872_v21 }
  0x94   :  { %v205_v44 = vsub.f32 %v145_v35, %v872_v21 }
  0x95   :  { %v236_v53 = vmul.f32 %v204_v38, %v204_v38 }
  0x96   :  { %v157_v45 = vpop.permute.xlu0 %156  ;;  %v237_v61 = vmul.f32 %v205_v44, %v205_v44  ;;  %v1067_v44 = vadd.s32 64, %v976_v22 }
  0x97   :  { %v208_v47 = vsub.f32 %v157_v45, %v872_v21  ;;  %v149_v48 = vpop.permute.xlu1 %148  ;;  %v252_v6 = vadd.f32 %v236_v53, %v220_v59  ;;  %v1070_v45 = vadd.s32 72, %v976_v22  ;;  %v1087_v53 = vadd.s32 112, %v976_v22 }
  0x98   :  { %v206_v54 = vsub.f32 %v149_v48, %v872_v21  ;;  %v253_v14 = vadd.f32 %v237_v61, %v221_v5  ;;  %v1079_v48 = vadd.s32 96, %v976_v22 }
  0x99   :  { %v240_v58 = vmul.f32 %v208_v47, %v208_v47  ;;  %v1042_v19 = vsel %vm328_vm2, inf, %v252_v6  ;;  %v1076_v47 = vadd.s32 88, %v976_v22 }
  0x9a   :  { %v238_v62 = vmul.f32 %v206_v54, %v206_v54  ;;  %v165_v63 = vpop.permute.xlu0 %164  ;;  %v1058_v28 = vsel %vm329_vm7, inf, %v253_v14  ;;  %v1090_v54 = vadd.s32 120, %v976_v22 }
  0x9b   :  { %v256_v1 = vadd.f32 %v240_v58, %v224_v56  ;;  %v210_v2 = vsub.f32 %v165_v63, %v872_v21  ;;  %v161_v3 = vpop.permute.xlu1 %160 }
  0x9c   :  { %v209_v7 = vsub.f32 %v161_v3, %v872_v21  ;;  %v254_v10 = vadd.f32 %v238_v62, %v222_v0  ;;  %v425_v21 = vsel %vm424_vm3, %v1026_v12, inf }
  0x9d   :  { %v242_v11 = vmul.f32 %v210_v2, %v210_v2  ;;  %v1031_v15 = vsel %vm332_vm4, inf, %v256_v1  ;;  %v426_v35 = vmin.f32 %v412_v17, %v425_v21 }
  0x9e   :  { %v241_v16 = vmul.f32 %v209_v7, %v209_v7  ;;  %v413_v23 = vmin.f32 %v1042_v19, %v1031_v15  ;;  %v1051_v24 = vsel %vm330_vm5, inf, %v254_v10 }
  0x9f   :  { %v258_v18 = vadd.f32 %v242_v11, %v226_v9 }
  0xa0   :  { %v257_v20 = vadd.f32 %v241_v16, %v225_v13  ;;  %v427_v37 = vmin.f32 %v426_v35, %v413_v23 }
  0xa1   :  { %v1056_v26 = vsel %vm334_vm6, inf, %v258_v18 }
  0xa2   :  { %v415_v29 = vmin.f32 %v1051_v24, %v1056_v26  ;;  %v1062_v30 = vsel %vm333_vm8, inf, %v257_v20 }
  0xa3   :  { %v414_v32 = vmin.f32 %v1058_v28, %v1062_v30 }
  0xa5   :  { %v428_v36 = vmin.f32 %v414_v32, %v415_v29 }
  0xa7   :  { %v429_v38 = vmin.f32 %v427_v37, %v428_v36 }
  0xa9   :  { %v430_v39 = vrot.slane %v429_v38, 4 }
  0xab   :  { %v431_v40 = vmin.f32 %v429_v38, %v430_v39 }
  0xad   :  { %v432_v41 = vrot.slane %v431_v40, 2 }
  0xaf   :  { %v433_v25 = vmin.f32 %v431_v40, %v432_v41 }
  0xb1   :  { %v434_v43 = vrot.slane %v433_v25, 1 }
  0xb3   :  { %v1081_v51 = vmin.f32 %v433_v25, %v434_v43 }
  0xb5   :  { %vm436_vm9 = vcmp.eq.f32.partialorder %v1024_v8, %v1081_v51  ;;  %vm437_vm10 = vcmp.eq.f32.partialorder %v1042_v19, %v1081_v51  ;;  %vm438_vm11 = vcmp.eq.f32.partialorder %v1058_v28, %v1081_v51  ;;  %vm439_vm12 = vcmp.eq.f32.partialorder %v1051_v24, %v1081_v51 }
  0xb6   :  { %vm440_vm13 = vcmp.eq.f32.partialorder %v1019_v4, %v1081_v51  ;;  %vm441_vm14 = vcmp.eq.f32.partialorder %v1031_v15, %v1081_v51  ;;  %vm442_vm15 = vcmp.eq.f32.partialorder %v1062_v30, %v1081_v51  ;;  %vm443_vm0 = vcmp.eq.f32.partialorder %v1056_v26, %v1081_v51 }
  0xb7   :  { %vm873_vm1 = vcmp.eq.f32.partialorder %v1081_v51, inf  ;;  %vm452_vm2 = vcmp.eq.f32.partialorder %v1026_v12, %v1081_v51  ;;  %v453_v56 = vsel %vm436_vm9, %v976_v22, 132  ;;  %v454_v57 = vsel %vm437_vm10, %v987_v31, 132 }
  0xb8   :  { %v455_v58 = vsel %vm438_vm11, %v1002_v42, 132  ;;  %v456_v59 = vsel %vm439_vm12, %v993_v34, 132  ;;  %v457_v60 = vsel %vm440_vm13, %v984_v27, 132  ;;  %v458_v61 = vsel %vm441_vm14, %v990_v33, 132 }
  0xb9   :  { %v459_v62 = vsel %vm442_vm15, %v1012_v50, 132  ;;  %v460_v63 = vsel %vm443_vm0, %v1009_v49, 132  ;;  %v461_v0 = vsel %vm873_vm1, %v1067_v44, 132  ;;  %v462_v1 = vsel %vm873_vm1, %v1070_v45, 132 }
  0xba   :  { %v463_v2 = vsel %vm873_vm1, %v1073_v46, 132  ;;  %v464_v3 = vsel %vm873_vm1, %v1076_v47, 132  ;;  %v465_v5 = vsel %vm873_vm1, %v1079_v48, 132  ;;  %v466_v6 = vsel %vm873_vm1, %v1084_v52, 132 }
  0xbb   :  { %v467_v7 = vsel %vm873_vm1, %v1087_v53, 132  ;;  %v468_v9 = vsel %vm873_vm1, %v1090_v54, 132  ;;  %v469_v10 = vsel %vm452_vm2, %v1093_v55, 132  ;;  %vm470_vm4 = vcmp.lt.s32.totalorder %v453_v56, %v457_v60 }
  0xbc   :  { %v471_v11 = vsel %vm470_vm4, %v453_v56, %v457_v60  ;;  %vm472_vm5 = vcmp.lt.s32.totalorder %v454_v57, %v458_v61  ;;  %vm474_vm6 = vcmp.lt.s32.totalorder %v455_v58, %v459_v62  ;;  %vm476_vm7 = vcmp.lt.s32.totalorder %v456_v59, %v460_v63 }
  0xbd   :  { %v473_v13 = vsel %vm472_vm5, %v454_v57, %v458_v61  ;;  %v475_v14 = vsel %vm474_vm6, %v455_v58, %v459_v62  ;;  %v477_v16 = vsel %vm476_vm7, %v456_v59, %v460_v63  ;;  %vm478_vm8 = vcmp.lt.s32.totalorder %v471_v11, %v461_v0 }
  0xbe   :  { %v479_v17 = vsel %vm478_vm8, %v471_v11, %v461_v0  ;;  %vm480_vm9 = vcmp.lt.s32.totalorder %v473_v13, %v462_v1  ;;  %vm482_vm10 = vcmp.lt.s32.totalorder %v475_v14, %v463_v2  ;;  %vm484_vm11 = vcmp.lt.s32.totalorder %v477_v16, %v464_v3 }
  0xbf   :  { %v481_v18 = vsel %vm480_vm9, %v473_v13, %v462_v1  ;;  %v483_v20 = vsel %vm482_vm10, %v475_v14, %v463_v2  ;;  %v485_v21 = vsel %vm484_vm11, %v477_v16, %v464_v3  ;;  %vm486_vm12 = vcmp.lt.s32.totalorder %v479_v17, %v465_v5 }
  0xc0   :  { %v487_v23 = vsel %vm486_vm12, %v479_v17, %v465_v5  ;;  %vm488_vm13 = vcmp.lt.s32.totalorder %v481_v18, %v466_v6  ;;  %vm490_vm14 = vcmp.lt.s32.totalorder %v483_v20, %v467_v7  ;;  %vm492_vm15 = vcmp.lt.s32.totalorder %v485_v21, %v468_v9 }
  0xc1   :  { %v491_v29 = vsel %vm490_vm14, %v483_v20, %v467_v7  ;;  %v493_v32 = vsel %vm492_vm15, %v485_v21, %v468_v9  ;;  %v494_v35 = vsel %vm424_vm3, %v469_v10, 2147483647  ;;  %v489_v36 = vsel %vm488_vm13, %v481_v18, %v466_v6 }
  0xc2   :  { %vm495_vm0 = vcmp.lt.s32.totalorder %v487_v23, %v494_v35  ;;  %vm499_vm1 = vcmp.lt.s32.totalorder %v491_v29, %v493_v32 }
  0xc3   :  { %v496_v37 = vsel %vm495_vm0, %v487_v23, %v494_v35  ;;  %v500_v39 = vsel %vm499_vm1, %v491_v29, %v493_v32 }
  0xc4   :  { %vm497_vm2 = vcmp.lt.s32.totalorder %v496_v37, %v489_v36 }
  0xc5   :  { %v498_v38 = vsel %vm497_vm2, %v496_v37, %v489_v36 }
  0xc6   :  { %vm501_vm4 = vcmp.lt.s32.totalorder %v498_v38, %v500_v39 }
  0xc7   :  { %v502_v40 = vsel %vm501_vm4, %v498_v38, %v500_v39 }
  0xc8   :  { %v503_v41 = vrot.slane %v502_v40, 4 }
  0xca   :  { %vm504_vm5 = vcmp.lt.s32.totalorder %v502_v40, %v503_v41 }
  0xcb   :  { %v505_v25 = vsel %vm504_vm5, %v502_v40, %v503_v41 }
  0xcc   :  { %v506_v43 = vrot.slane %v505_v25, 2 }
  0xce   :  { %vm507_vm6 = vcmp.lt.s32.totalorder %v505_v25, %v506_v43 }
  0xcf   :  { %v508_v56 = vsel %vm507_vm6, %v505_v25, %v506_v43 }
  0xd0   :  { %v509_v57 = vrot.slane %v508_v56, 1 }
  0xd2   :  { %vm510_vm7 = vcmp.lt.s32.totalorder %v508_v56, %v509_v57 }
  0xd3   :  { %v511_v58 = vsel %vm510_vm7, %v508_v56, %v509_v57 }
  0xd4   :  { %vm512_vm8 = vcmp.eq.s32.totalorder %v976_v22, %v511_v58  ;;  %vm513_vm9 = vcmp.eq.s32.totalorder %v987_v31, %v511_v58  ;;  %vm514_vm10 = vcmp.eq.s32.totalorder %v1002_v42, %v511_v58  ;;  %vm515_vm11 = vcmp.eq.s32.totalorder %v993_v34, %v511_v58 }
  0xd5   :  { %vm516_vm12 = vcmp.eq.s32.totalorder %v984_v27, %v511_v58  ;;  %vm517_vm13 = vcmp.eq.s32.totalorder %v990_v33, %v511_v58  ;;  %vm518_vm14 = vcmp.eq.s32.totalorder %v1012_v50, %v511_v58  ;;  %vm519_vm15 = vcmp.eq.s32.totalorder %v1009_v49, %v511_v58 }
  0xd6   :  { %vm528_vm0 = vcmp.eq.s32.totalorder %v1093_v55, %v511_v58  ;;  %v1161_v59 = vsel %vm512_vm8, inf, %v1024_v8  ;;  %v1164_v60 = vsel %vm513_vm9, inf, %v1042_v19  ;;  %v1167_v61 = vsel %vm514_vm10, inf, %v1058_v28 }
  0xd7   :  { %v1170_v62 = vsel %vm515_vm11, inf, %v1051_v24  ;;  %v1173_v63 = vsel %vm516_vm12, inf, %v1019_v4  ;;  %v1176_v0 = vsel %vm517_vm13, inf, %v1031_v15  ;;  %v1179_v1 = vsel %vm518_vm14, inf, %v1062_v30 }
  0xd8   :  { %v1182_v8 = vsel %vm519_vm15, inf, %v1056_v26  ;;  %v1185_v19 = vsel %vm528_vm0, inf, %v1026_v12  ;;  %v546_v28 = vmin.f32 %v1161_v59, %v1173_v63  ;;  %v548_v24 = vmin.f32 %v1167_v61, %v1179_v1 }
  0xd9   :  { %v549_v4 = vmin.f32 %v1170_v62, %v1182_v8  ;;  %v558_v15 = vsel %vm424_vm3, %v1185_v19, inf  ;;  %v547_v30 = vmin.f32 %v1164_v60, %v1176_v0 }
  0xda   :  { %v559_v26 = vmin.f32 %v546_v28, %v558_v15 }
  0xdb   :  { %v561_v3 = vmin.f32 %v548_v24, %v549_v4 }
  0xdc   :  { %v560_v2 = vmin.f32 %v559_v26, %v547_v30 }
  0xde   :  { %v562_v12 = vmin.f32 %v560_v2, %v561_v3 }
  0xe0   :  { %v563_v5 = vrot.slane %v562_v12, 4 }
  0xe2   :  { %v564_v6 = vmin.f32 %v562_v12, %v563_v5 }
  0xe4   :  { %v565_v7 = vrot.slane %v564_v6, 2 }
  0xe6   :  { %v566_v9 = vmin.f32 %v564_v6, %v565_v7 }
  0xe8   :  { %v567_v10 = vrot.slane %v566_v9, 1 }
  0xea   :  { %v1197_v11 = vmin.f32 %v566_v9, %v567_v10 }
  0xec   :  { %vm569_vm1 = vcmp.eq.f32.partialorder %v1161_v59, %v1197_v11  ;;  %vm570_vm2 = vcmp.eq.f32.partialorder %v1164_v60, %v1197_v11  ;;  %vm571_vm4 = vcmp.eq.f32.partialorder %v1167_v61, %v1197_v11  ;;  %vm572_vm5 = vcmp.eq.f32.partialorder %v1170_v62, %v1197_v11 }
  0xed   :  { %vm573_vm6 = vcmp.eq.f32.partialorder %v1173_v63, %v1197_v11  ;;  %vm574_vm7 = vcmp.eq.f32.partialorder %v1176_v0, %v1197_v11  ;;  %vm575_vm8 = vcmp.eq.f32.partialorder %v1179_v1, %v1197_v11  ;;  %vm576_vm9 = vcmp.eq.f32.partialorder %v1182_v8, %v1197_v11 }
  0xee   :  { %vm881_vm10 = vcmp.eq.f32.partialorder %v1197_v11, inf  ;;  %vm585_vm11 = vcmp.eq.f32.partialorder %v1185_v19, %v1197_v11  ;;  %v586_v13 = vsel %vm569_vm1, %v976_v22, 132  ;;  %v587_v14 = vsel %vm570_vm2, %v987_v31, 132 }
  0xef   :  { %v588_v16 = vsel %vm571_vm4, %v1002_v42, 132  ;;  %v589_v17 = vsel %vm572_vm5, %v993_v34, 132  ;;  %v590_v18 = vsel %vm573_vm6, %v984_v27, 132  ;;  %v591_v20 = vsel %vm574_vm7, %v990_v33, 132 }
  0xf0   :  { %v592_v21 = vsel %vm575_vm8, %v1012_v50, 132  ;;  %v593_v23 = vsel %vm576_vm9, %v1009_v49, 132  ;;  %v594_v29 = vsel %vm881_vm10, %v1067_v44, 132  ;;  %v595_v32 = vsel %vm881_vm10, %v1070_v45, 132 }
  0xf1   :  { %v596_v35 = vsel %vm881_vm10, %v1073_v46, 132  ;;  %v597_v36 = vsel %vm881_vm10, %v1076_v47, 132  ;;  %v598_v37 = vsel %vm881_vm10, %v1079_v48, 132  ;;  %v599_v38 = vsel %vm881_vm10, %v1084_v52, 132 }
  0xf2   :  { %v600_v39 = vsel %vm881_vm10, %v1087_v53, 132  ;;  %v601_v40 = vsel %vm881_vm10, %v1090_v54, 132  ;;  %v602_v41 = vsel %vm585_vm11, %v1093_v55, 132  ;;  %vm603_vm12 = vcmp.lt.s32.totalorder %v586_v13, %v590_v18 }
  0xf3   :  { %v604_v25 = vsel %vm603_vm12, %v586_v13, %v590_v18  ;;  %vm605_vm13 = vcmp.lt.s32.totalorder %v587_v14, %v591_v20  ;;  %vm607_vm14 = vcmp.lt.s32.totalorder %v588_v16, %v592_v21  ;;  %vm609_vm15 = vcmp.lt.s32.totalorder %v589_v17, %v593_v23 }
  0xf4   :  { %v606_v43 = vsel %vm605_vm13, %v587_v14, %v591_v20  ;;  %v608_v56 = vsel %vm607_vm14, %v588_v16, %v592_v21  ;;  %v610_v57 = vsel %vm609_vm15, %v589_v17, %v593_v23  ;;  %vm611_vm0 = vcmp.lt.s32.totalorder %v604_v25, %v594_v29 }
  0xf5   :  { %v612_v58 = vsel %vm611_vm0, %v604_v25, %v594_v29  ;;  %vm613_vm1 = vcmp.lt.s32.totalorder %v606_v43, %v595_v32  ;;  %vm615_vm2 = vcmp.lt.s32.totalorder %v608_v56, %v596_v35  ;;  %vm617_vm4 = vcmp.lt.s32.totalorder %v610_v57, %v597_v36 }
  0xf6   :  { %v614_v28 = vsel %vm613_vm1, %v606_v43, %v595_v32  ;;  %v616_v24 = vsel %vm615_vm2, %v608_v56, %v596_v35  ;;  %v618_v4 = vsel %vm617_vm4, %v610_v57, %v597_v36  ;;  %vm619_vm5 = vcmp.lt.s32.totalorder %v612_v58, %v598_v37 }
  0xf7   :  { %v620_v15 = vsel %vm619_vm5, %v612_v58, %v598_v37  ;;  %vm621_vm6 = vcmp.lt.s32.totalorder %v614_v28, %v599_v38  ;;  %vm623_vm7 = vcmp.lt.s32.totalorder %v616_v24, %v600_v39  ;;  %vm625_vm8 = vcmp.lt.s32.totalorder %v618_v4, %v601_v40 }
  0xf8   :  { %v624_v30 = vsel %vm623_vm7, %v616_v24, %v600_v39  ;;  %v626_v26 = vsel %vm625_vm8, %v618_v4, %v601_v40  ;;  %v627_v2 = vsel %vm424_vm3, %v602_v41, 2147483647  ;;  %v622_v3 = vsel %vm621_vm6, %v614_v28, %v599_v38 }
  0xf9   :  { %vm628_vm9 = vcmp.lt.s32.totalorder %v620_v15, %v627_v2  ;;  %vm632_vm10 = vcmp.lt.s32.totalorder %v624_v30, %v626_v26 }
  0xfa   :  { %v629_v12 = vsel %vm628_vm9, %v620_v15, %v627_v2  ;;  %v633_v6 = vsel %vm632_vm10, %v624_v30, %v626_v26 }
  0xfb   :  { %vm630_vm11 = vcmp.lt.s32.totalorder %v629_v12, %v622_v3 }
  0xfc   :  { %v631_v5 = vsel %vm630_vm11, %v629_v12, %v622_v3 }
  0xfd   :  { %vm634_vm12 = vcmp.lt.s32.totalorder %v631_v5, %v633_v6 }
  0xfe   :  { %v635_v7 = vsel %vm634_vm12, %v631_v5, %v633_v6 }
  0xff   :  { %v636_v9 = vrot.slane %v635_v7, 4 }
 0x101   :  { %vm637_vm13 = vcmp.lt.s32.totalorder %v635_v7, %v636_v9 }
 0x102   :  { %v638_v10 = vsel %vm637_vm13, %v635_v7, %v636_v9 }
 0x103   :  { %v639_v13 = vrot.slane %v638_v10, 2 }
 0x105   :  { %vm640_vm14 = vcmp.lt.s32.totalorder %v638_v10, %v639_v13 }
 0x106   :  { %v641_v14 = vsel %vm640_vm14, %v638_v10, %v639_v13 }
 0x107   :  { %v642_v16 = vrot.slane %v641_v14, 1 }
 0x109   :  { %vm643_vm15 = vcmp.lt.s32.totalorder %v641_v14, %v642_v16 }
 0x10a   :  { %v644_v17 = vsel %vm643_vm15, %v641_v14, %v642_v16 }
 0x10b   :  { %vm645_vm0 = vcmp.eq.s32.totalorder %v976_v22, %v644_v17  ;;  %vm646_vm1 = vcmp.eq.s32.totalorder %v987_v31, %v644_v17  ;;  %vm647_vm2 = vcmp.eq.s32.totalorder %v1002_v42, %v644_v17  ;;  %vm648_vm4 = vcmp.eq.s32.totalorder %v993_v34, %v644_v17 }
 0x10c   :  { %vm649_vm5 = vcmp.eq.s32.totalorder %v984_v27, %v644_v17  ;;  %vm650_vm6 = vcmp.eq.s32.totalorder %v990_v33, %v644_v17  ;;  %vm651_vm7 = vcmp.eq.s32.totalorder %v1012_v50, %v644_v17  ;;  %vm652_vm8 = vcmp.eq.s32.totalorder %v1009_v49, %v644_v17 }
 0x10d   :  { %vm661_vm9 = vcmp.eq.s32.totalorder %v1093_v55, %v644_v17  ;;  %v1265_v18 = vsel %vm645_vm0, inf, %v1161_v59  ;;  %v1268_v20 = vsel %vm646_vm1, inf, %v1164_v60  ;;  %v1271_v21 = vsel %vm647_vm2, inf, %v1167_v61 }
 0x10e   :  { %v1274_v23 = vsel %vm648_vm4, inf, %v1170_v62  ;;  %v1277_v29 = vsel %vm649_vm5, inf, %v1173_v63  ;;  %v1280_v32 = vsel %vm650_vm6, inf, %v1176_v0  ;;  %v1283_v35 = vsel %vm651_vm7, inf, %v1179_v1 }
 0x10f   :  { %v1286_v59 = vsel %vm652_vm8, inf, %v1182_v8  ;;  %v1289_v60 = vsel %vm661_vm9, inf, %v1185_v19  ;;  %v679_v61 = vmin.f32 %v1265_v18, %v1277_v29  ;;  %v681_v62 = vmin.f32 %v1271_v21, %v1283_v35 }
 0x110   :  { %v682_v63 = vmin.f32 %v1274_v23, %v1286_v59  ;;  %v691_v0 = vsel %vm424_vm3, %v1289_v60, inf  ;;  %v680_v1 = vmin.f32 %v1268_v20, %v1280_v32 }
 0x111   :  { %v692_v8 = vmin.f32 %v679_v61, %v691_v0 }
 0x112   :  { %v694_v37 = vmin.f32 %v681_v62, %v682_v63 }
 0x113   :  { %v693_v36 = vmin.f32 %v692_v8, %v680_v1 }
 0x115   :  { %v695_v19 = vmin.f32 %v693_v36, %v694_v37 }
 0x117   :  { %v696_v38 = vrot.slane %v695_v19, 4 }
 0x119   :  { %v697_v39 = vmin.f32 %v695_v19, %v696_v38 }
 0x11b   :  { %v698_v40 = vrot.slane %v697_v39, 2 }
 0x11d   :  { %v699_v41 = vmin.f32 %v697_v39, %v698_v40 }
 0x11f   :  { %v700_v25 = vrot.slane %v699_v41, 1 }
 0x121   :  { %v1301_v43 = vmin.f32 %v699_v41, %v700_v25 }
 0x123   :  { %vm702_vm10 = vcmp.eq.f32.partialorder %v1265_v18, %v1301_v43  ;;  %vm703_vm11 = vcmp.eq.f32.partialorder %v1268_v20, %v1301_v43  ;;  %vm704_vm12 = vcmp.eq.f32.partialorder %v1271_v21, %v1301_v43  ;;  %vm705_vm13 = vcmp.eq.f32.partialorder %v1274_v23, %v1301_v43 }
 0x124   :  { %vm706_vm14 = vcmp.eq.f32.partialorder %v1277_v29, %v1301_v43  ;;  %vm707_vm15 = vcmp.eq.f32.partialorder %v1280_v32, %v1301_v43  ;;  %vm708_vm0 = vcmp.eq.f32.partialorder %v1283_v35, %v1301_v43  ;;  %vm709_vm1 = vcmp.eq.f32.partialorder %v1286_v59, %v1301_v43 }
 0x125   :  { %vm889_vm2 = vcmp.eq.f32.partialorder %v1301_v43, inf  ;;  %vm718_vm4 = vcmp.eq.f32.partialorder %v1289_v60, %v1301_v43  ;;  %v719_v56 = vsel %vm702_vm10, %v976_v22, 132  ;;  %v720_v57 = vsel %vm703_vm11, %v987_v31, 132 }
 0x126   :  { %v721_v58 = vsel %vm704_vm12, %v1002_v42, 132  ;;  %v722_v28 = vsel %vm705_vm13, %v993_v34, 132  ;;  %v723_v24 = vsel %vm706_vm14, %v984_v27, 132  ;;  %v724_v4 = vsel %vm707_vm15, %v990_v33, 132 }
 0x127   :  { %v725_v15 = vsel %vm708_vm0, %v1012_v50, 132  ;;  %v726_v30 = vsel %vm709_vm1, %v1009_v49, 132  ;;  %v727_v26 = vsel %vm889_vm2, %v1067_v44, 132  ;;  %v728_v2 = vsel %vm889_vm2, %v1070_v45, 132 }
 0x128   :  { %v729_v3 = vsel %vm889_vm2, %v1073_v46, 132  ;;  %v730_v12 = vsel %vm889_vm2, %v1076_v47, 132  ;;  %v731_v5 = vsel %vm889_vm2, %v1079_v48, 132  ;;  %v732_v44 = vsel %vm889_vm2, %v1084_v52, 132 }
 0x129   :  { %v733_v45 = vsel %vm889_vm2, %v1087_v53, 132  ;;  %v734_v46 = vsel %vm889_vm2, %v1090_v54, 132  ;;  %v735_v47 = vsel %vm718_vm4, %v1093_v55, 132  ;;  %vm736_vm5 = vcmp.lt.s32.totalorder %v719_v56, %v723_v24 }
 0x12a   :  { %v737_v6 = vsel %vm736_vm5, %v719_v56, %v723_v24  ;;  %vm738_vm6 = vcmp.lt.s32.totalorder %v720_v57, %v724_v4  ;;  %vm740_vm7 = vcmp.lt.s32.totalorder %v721_v58, %v725_v15  ;;  %vm742_vm8 = vcmp.lt.s32.totalorder %v722_v28, %v726_v30 }
 0x12b   :  { %v739_v48 = vsel %vm738_vm6, %v720_v57, %v724_v4  ;;  %v741_v52 = vsel %vm740_vm7, %v721_v58, %v725_v15  ;;  %v743_v7 = vsel %vm742_vm8, %v722_v28, %v726_v30  ;;  %vm744_vm9 = vcmp.lt.s32.totalorder %v737_v6, %v727_v26 }
 0x12c   :  { %v745_v9 = vsel %vm744_vm9, %v737_v6, %v727_v26  ;;  %vm746_vm10 = vcmp.lt.s32.totalorder %v739_v48, %v728_v2  ;;  %vm748_vm11 = vcmp.lt.s32.totalorder %v741_v52, %v729_v3  ;;  %vm750_vm12 = vcmp.lt.s32.totalorder %v743_v7, %v730_v12 }
 0x12d   :  { %v747_v53 = vsel %vm746_vm10, %v739_v48, %v728_v2  ;;  %v749_v54 = vsel %vm748_vm11, %v741_v52, %v729_v3  ;;  %v751_v10 = vsel %vm750_vm12, %v743_v7, %v730_v12  ;;  %vm752_vm13 = vcmp.lt.s32.totalorder %v745_v9, %v731_v5 }
 0x12e   :  { %v753_v13 = vsel %vm752_vm13, %v745_v9, %v731_v5  ;;  %vm754_vm14 = vcmp.lt.s32.totalorder %v747_v53, %v732_v44  ;;  %vm756_vm15 = vcmp.lt.s32.totalorder %v749_v54, %v733_v45  ;;  %vm758_vm0 = vcmp.lt.s32.totalorder %v751_v10, %v734_v46 }
 0x12f   :  { %v757_v14 = vsel %vm756_vm15, %v749_v54, %v733_v45  ;;  %v759_v16 = vsel %vm758_vm0, %v751_v10, %v734_v46  ;;  %v760_v17 = vsel %vm424_vm3, %v735_v47, 2147483647  ;;  %v755_v61 = vsel %vm754_vm14, %v747_v53, %v732_v44 }
 0x130   :  { %vm761_vm1 = vcmp.lt.s32.totalorder %v753_v13, %v760_v17  ;;  %vm765_vm2 = vcmp.lt.s32.totalorder %v757_v14, %v759_v16 }
 0x131   :  { %v762_v62 = vsel %vm761_vm1, %v753_v13, %v760_v17  ;;  %v766_v0 = vsel %vm765_vm2, %v757_v14, %v759_v16  ;;  %vm835_vm2 = vcmask 1040384  }
 0x132   :  { %vm763_vm4 = vcmp.lt.s32.totalorder %v762_v62, %v755_v61 }
 0x133   :  { %v764_v63 = vsel %vm763_vm4, %v762_v62, %v755_v61  ;;  %vm837_vm4 = vcmask 1041408  }
 0x134   :  { %vm767_vm5 = vcmp.lt.s32.totalorder %v764_v63, %v766_v0 }
 0x135   :  { %v768_v1 = vsel %vm767_vm5, %v764_v63, %v766_v0  ;;  %vm839_vm5 = vcmask 1042432  }
 0x136   :  { %v769_v8 = vrot.slane %v768_v1, 4 }
 0x138   :  { %vm770_vm6 = vcmp.lt.s32.totalorder %v768_v1, %v769_v8 }
 0x139   :  { %v771_v36 = vsel %vm770_vm6, %v768_v1, %v769_v8 }
 0x13a   :  { %v772_v37 = vrot.slane %v771_v36, 2 }
 0x13c   :  { %vm773_vm7 = vcmp.lt.s32.totalorder %v771_v36, %v772_v37 }
 0x13d   :  { %v774_v19 = vsel %vm773_vm7, %v771_v36, %v772_v37 }
 0x13e   :  { %v775_v38 = vrot.slane %v774_v19, 1 }
 0x140   :  { %vm776_vm8 = vcmp.lt.s32.totalorder %v774_v19, %v775_v38 }
 0x141   :  { %v777_v39 = vsel %vm776_vm8, %v774_v19, %v775_v38 }
 0x142   :  { %vm778_vm9 = vcmp.eq.s32.totalorder %v976_v22, %v777_v39  ;;  %vm779_vm10 = vcmp.eq.s32.totalorder %v987_v31, %v777_v39  ;;  %vm780_vm11 = vcmp.eq.s32.totalorder %v1002_v42, %v777_v39  ;;  %vm781_vm12 = vcmp.eq.s32.totalorder %v993_v34, %v777_v39 }
 0x143   :  { %vm782_vm13 = vcmp.eq.s32.totalorder %v984_v27, %v777_v39  ;;  %vm783_vm14 = vcmp.eq.s32.totalorder %v990_v33, %v777_v39  ;;  %vm784_vm15 = vcmp.eq.s32.totalorder %v1012_v50, %v777_v39  ;;  %vm785_vm0 = vcmp.eq.s32.totalorder %v1009_v49, %v777_v39 }
 0x144   :  { %vm794_vm1 = vcmp.eq.s32.totalorder %v1093_v55, %v777_v39  ;;  %v795_v40 = vsel %vm778_vm9, inf, %v1265_v18  ;;  %v796_v22 = vsel %vm779_vm10, inf, %v1268_v20  ;;  %v797_v31 = vsel %vm780_vm11, inf, %v1271_v21 }
 0x145   :  { %v798_v42 = vsel %vm781_vm12, inf, %v1274_v23  ;;  %v799_v34 = vsel %vm782_vm13, inf, %v1277_v29  ;;  %v800_v27 = vsel %vm783_vm14, inf, %v1280_v32  ;;  %v801_v33 = vsel %vm784_vm15, inf, %v1283_v35 }
 0x146   :  { %v802_v50 = vsel %vm785_vm0, inf, %v1286_v59  ;;  %v811_v49 = vsel %vm794_vm1, inf, %v1289_v60  ;;  %v812_v41 = vmin.f32 %v795_v40, %v799_v34  ;;  %v814_v55 = vmin.f32 %v797_v31, %v801_v33 }
 0x147   :  { %v815_v25 = vmin.f32 %v798_v42, %v802_v50  ;;  %v824_v18 = vsel %vm424_vm3, %v811_v49, inf  ;;  %v813_v20 = vmin.f32 %v796_v22, %v800_v27  ;;  %v836_v60 = vsel %vm835_vm2, %v1081_v51, %v1197_v11 }
 0x148   :  { %v825_v56 = vmin.f32 %v812_v41, %v824_v18  ;;  %v838_v24 = vsel %vm837_vm4, %v836_v60, %v1301_v43 }
 0x149   :  { %v827_v57 = vmin.f32 %v814_v55, %v815_v25 }
 0x14a   :  { %v826_v21 = vmin.f32 %v825_v56, %v813_v20 }
 0x14c   :  { %v828_v23 = vmin.f32 %v826_v21, %v827_v57 }
 0x14e   :  { %v829_v58 = vrot.slane %v828_v23, 4 }
 0x150   :  { %v830_v29 = vmin.f32 %v828_v23, %v829_v58 }
 0x152   :  { %v831_v28 = vrot.slane %v830_v29, 2 }
 0x154   :  { %v832_v32 = vmin.f32 %v830_v29, %v831_v28 }
 0x156   :  { %v833_v35 = vrot.slane %v832_v32, 1 }
 0x158   :  { %v834_v59 = vmin.f32 %v832_v32, %v833_v35 }
 0x15a   :  { %v840_v4 = vsel %vm839_vm5, %v838_v24, %v834_v59 }
 0x15b   :  { %906 = vrsqrt.f32 %v840_v4  ;;  %vm851_vm3 = vcmp.eq.f32.partialorder %v840_v4, inf  ;;  %v854_v26 = vand.u32 2147483648, %v840_v4  ;;  %vm853_vm6 = vcmp.eq.f32.partialorder %v840_v4, 0.0 }
 0x168   :  { %v907_v15 = vpop.eup %906 }
 0x169   :  { %v850_v30 = vmul.f32 %v907_v15, %v840_v4 }
 0x16b   :  { %v852_v2 = vsel %vm851_vm3, %v840_v4, %v850_v30 }
 0x16c   :  { %v855_v3 = vsel %vm853_vm6, %v854_v26, %v852_v2 }
 0x16d   :  { %856 = vst [vmem:[#allocation2] sm:$0xf] %v855_v3 }
 0x16e   :  { %919 = shalt.err (!%p916_p4)
}
 0x16f   :  { %866 = dma.vmem_to_hbm [thread:$0]  %s864_s28, 64, %s1386_s2, [#allocation3]  }
 0x170   :  { %928 = dma.done.wait [#allocation3], 64  }
 0x171   :  { %929 = vsyncadd [#allocation3], 4294967232 }
 0x172   :  { %870 = vsyncpa [#allocation3], 1 }

</bundles_post_ra>
